<compile_context>
chip_gen: v5e
topology: v5e:2x2
jax: 0.10.0
libtpu: 0.0.40
codegen_flags: <defaults>
</compile_context>

<pallas_src>
import functools

import jax
import jax.numpy as jnp
from jax.experimental import pallas as pl
from jax.experimental.pallas import tpu as pltpu

OUT_PAD = 8  # pad action dim to a multiple of 8 (sublane), not 128


def _round_up(x, m):
    return (x + m - 1) // m * m


def _ceil_div(a, b):
    return -(-a // b)


# ----------------------------------------------------------------------------
# Kernel
# ----------------------------------------------------------------------------
def dqn_kernel(x_ref,
               w1_ref, b1_ref,
               w2_ref, b2_ref,
               w3_ref, b3_ref,
               w4_ref, b4_ref,
               out_ref):
    # fc1 + relu : full f32 (state features may have wide dynamic range;
    # K = state_size is tiny so the f32 MXU passes are negligible).
    h = jnp.dot(x_ref[...], w1_ref[...], preferred_element_type=jnp.float32)
    h = jnp.maximum(h + b1_ref[...], 0.0)
    # fc2 + relu : bf16 MXU inputs, f32 accumulation; bias/ReLU stay f32
    # (friendly to v5e's f32-only VPU).
    h = jnp.dot(h.astype(jnp.bfloat16), w2_ref[...],
                preferred_element_type=jnp.float32)
    h = jnp.maximum(h + b2_ref[...], 0.0)
    # fc3 + relu
    h = jnp.dot(h.astype(jnp.bfloat16), w3_ref[...],
                preferred_element_type=jnp.float32)
    h = jnp.maximum(h + b3_ref[...], 0.0)
    # fc4 (no activation); W4/b4 are zero-padded to a multiple of 8 columns
    h = jnp.dot(h.astype(jnp.bfloat16), w4_ref[...],
                preferred_element_type=jnp.float32)
    out_ref[...] = (h + b4_ref[...]).astype(out_ref.dtype)


# ----------------------------------------------------------------------------
# One-time parameter preprocessing (hoisted out of the per-step forward)
# ----------------------------------------------------------------------------
def prepare_params(params):
    """Cast fc2..fc4 weights to bf16 (biases stay f32), keep fc1 in f32,
    zero-pad fc4 to a multiple of 8 output columns."""
    action_size = params["w4"].shape[1]
    padded_act = _round_up(action_size, OUT_PAD)
    pad = padded_act - action_size
    prepped = {
        "w1": params["w1"].astype(jnp.float32),
        "b1": params["b1"].astype(jnp.float32),
        "w2": params["w2"].astype(jnp.bfloat16),
        "b2": params["b2"].astype(jnp.float32),
        "w3": params["w3"].astype(jnp.bfloat16),
        "b3": params["b3"].astype(jnp.float32),
        "w4": jnp.pad(params["w4"], ((0, 0), (0, pad))).astype(jnp.bfloat16),
        "b4": jnp.pad(params["b4"], ((0, 0), (0, pad))).astype(jnp.float32),
    }
    return prepped, action_size, padded_act


# ----------------------------------------------------------------------------
# Batch-tile selection
# ----------------------------------------------------------------------------
def _tile_and_grid(batch, tb):
    """Pick a batch tile (multiple of 8, capped at tb) such that batches
    >= 128 are split into an even number of tiles (v7x dual-TC split)."""
    if batch < 128:
        # Pure launch-overhead regime; one 8-aligned tile, don't chase it.
        tb_eff = max(8, _round_up(batch, 8))
    else:
        n_pairs = max(1, _ceil_div(batch, 2 * tb))
        tb_eff = _round_up(_ceil_div(batch, 2 * n_pairs), 8)
    padded_batch = _round_up(batch, tb_eff)
    return tb_eff, padded_batch


# ----------------------------------------------------------------------------
# Forward
# ----------------------------------------------------------------------------
@functools.partial(jax.jit, static_argnames=("action_size", "padded_act", "tb"))
def _dqn_forward_impl(x, prepped, *, action_size, padded_act, tb):
    batch, state_size = x.shape
    tb_eff, padded_batch = _tile_and_grid(batch, tb)
    grid = (padded_batch // tb_eff,)

    xp = x.astype(jnp.float32)
    if padded_batch != batch:               # only ragged tails pay the pad copy
        xp = jnp.pad(xp, ((0, padded_batch - batch), (0, 0)))

    def resident(arr):
        # full-array block, constant index_map -> DMA'd once, VMEM-resident
        return pl.BlockSpec(arr.shape, lambda i: (0, 0))

    cp_kwargs = dict(dimension_semantics=("parallel",))
    if tb_eff > 2048:
        # Only needed if the tile is pushed very large (v7x: 64 MiB physical,
        # 32 MiB scoped default).
        cp_kwargs["vmem_limit_bytes"] = 64 * 1024 * 1024

    out_padded = pl.pallas_call(
        dqn_kernel,
        out_shape=jax.ShapeDtypeStruct((padded_batch, padded_act), jnp.float32),
        grid=grid,
        in_specs=[
            pl.BlockSpec((tb_eff, state_size), lambda i: (i, 0)),   # x tiles
            resident(prepped["w1"]), resident(prepped["b1"]),
            resident(prepped["w2"]), resident(prepped["b2"]),
            resident(prepped["w3"]), resident(prepped["b3"]),
            resident(prepped["w4"]), resident(prepped["b4"]),
        ],
        out_specs=pl.BlockSpec((tb_eff, padded_act), lambda i: (i, 0)),
        compiler_params=pltpu.CompilerParams(**cp_kwargs),
    )(
        xp,
        prepped["w1"], prepped["b1"],
        prepped["w2"], prepped["b2"],
        prepped["w3"], prepped["b3"],
        prepped["w4"], prepped["b4"],
    )

    if padded_batch != batch or padded_act != action_size:
        out_padded = out_padded[:batch, :action_size]
    return out_padded
    # TODO(synk): for the action-selection path, fuse row-wise argmax/max-Q
    # into the kernel so the stored output is (tb, 1) instead of Q-values.


def make_dqn_forward(params, *, tb=1024):
    """Preprocess params ONCE and return a forward closure.  Use this in the
    training / acting loop so weight casts are not re-dispatched per step."""
    prepped, action_size, padded_act = prepare_params(params)
    prepped = jax.tree_util.tree_map(jnp.asarray, prepped)

    def forward(x):
        return _dqn_forward_impl(x, prepped, action_size=action_size,
                                 padded_act=padded_act, tb=tb)
    return forward


def dqn_forward(x, params, *, tb=1024):
    """Convenience one-shot API (re-preps params each call; prefer
    make_dqn_forward for repeated use)."""
    return make_dqn_forward(params, tb=tb)(x)


# ----------------------------------------------------------------------------
# Init + references
# ----------------------------------------------------------------------------
def init_params(key, state_size, action_size):
    """Deterministic init mirroring nn.Linear default (uniform +-1/sqrt(fan_in)).
    Weights are stored already transposed to (in, out)."""
    dims = [(state_size, 128), (128, 256), (256, 128), (128, action_size)]
    params = {}
    for i, (fan_in, fan_out) in enumerate(dims, start=1):
        key, kw, kb = jax.random.split(key, 3)
        bound = 1.0 / jnp.sqrt(float(fan_in))
        params[f"w{i}"] = jax.random.uniform(
            kw, (fan_in, fan_out), jnp.float32, minval=-bound, maxval=bound)
        params[f"b{i}"] = jax.random.uniform(
            kb, (1, fan_out), jnp.float32, minval=-bound, maxval=bound)
    return params


def reference_forward_mixed(x, params):
    """Reference with the same recipe as the kernel: fc1 in f32, fc2..fc4 with
    bf16 inputs and f32 accumulation."""
    def bf(a):
        return a.astype(jnp.bfloat16)
    h = jnp.maximum(x @ params["w1"] + params["b1"], 0.0)
    h = jnp.dot(bf(h), bf(params["w2"]), preferred_element_type=jnp.float32)
    h = jnp.maximum(h + params["b2"], 0.0)
    h = jnp.dot(bf(h), bf(params["w3"]), preferred_element_type=jnp.float32)
    h = jnp.maximum(h + params["b3"], 0.0)
    h = jnp.dot(bf(h), bf(params["w4"]), preferred_element_type=jnp.float32)
    return h + params["b4"]


def reference_forward_f32(x, params):
    h = jnp.maximum(x @ params["w1"] + params["b1"], 0.0)
    h = jnp.maximum(h @ params["w2"] + params["b2"], 0.0)
    h = jnp.maximum(h @ params["w3"] + params["b3"], 0.0)
    return h @ params["w4"] + params["b4"]


# ----------------------------------------------------------------------------
# Self-test
# ----------------------------------------------------------------------------
if __name__ == "__main__":
    state_size = 8
    action_size = 4

    key = jax.random.PRNGKey(0)
    key, kp = jax.random.split(key)
    params = init_params(kp, state_size, action_size)

    forward = make_dqn_forward(params, tb=1024)   # params prepped once

    # Case 1: tiny action-selection batch (grid = 1, padded rows sliced off).
    key, kx = jax.random.split(key)
    x_small = jax.random.normal(kx, (2, state_size), jnp.float32)
    out_small = jax.block_until_ready(forward(x_small))
    assert out_small.shape == (2, action_size)

    # Case 2: training-style batch > 128 -> multi-tile grid (even tile count)
    # with a ragged tail that exercises the padding + slice path.
    key, kx2 = jax.random.split(key)
    x_big = jax.random.normal(kx2, (200, state_size), jnp.float32)
    out_big = jax.block_until_ready(forward(x_big))
    assert out_big.shape == (200, action_size)

    for x, out in ((x_small, out_small), (x_big, out_big)):
        ref_mixed = reference_forward_mixed(x, params)
        assert jnp.allclose(out, ref_mixed, atol=2e-2, rtol=2e-2), \
            "mismatch vs mixed-precision reference"
        ref_f32 = reference_forward_f32(x, params)
        assert jnp.allclose(out, ref_f32, atol=1e-1, rtol=1e-1), \
            "mismatch vs f32 reference"

    print("KERNEL_OK")
</pallas_src>

<mosaic_0001>
module attributes {stable_mosaic.version = 11 : i64} {
  func.func @dqn_kernel(%arg0: i32, %arg1: memref<8x8xf32, #tpu.memory_space<vmem>>, %arg2: memref<8x128xf32, #tpu.memory_space<vmem>>, %arg3: memref<1x128xf32, #tpu.memory_space<vmem>>, %arg4: memref<128x256xbf16, #tpu.memory_space<vmem>>, %arg5: memref<1x256xf32, #tpu.memory_space<vmem>>, %arg6: memref<256x128xbf16, #tpu.memory_space<vmem>>, %arg7: memref<1x128xf32, #tpu.memory_space<vmem>>, %arg8: memref<128x8xbf16, #tpu.memory_space<vmem>>, %arg9: memref<1x8xf32, #tpu.memory_space<vmem>>, %arg10: memref<8x8xf32, #tpu.memory_space<vmem>>) attributes {dimension_semantics = [#tpu.dimension_semantics<parallel>], iteration_bounds = array<i64: 1>, scalar_prefetch = 0 : i64, scratch_operands = 0 : i64, tpu.core_type = #tpu.core_type<tc>, window_params = [{transform_indices = @transform_0, window_bounds = array<i64: 8, 8>}, {pipeline_mode = #tpu.pipeline_mode<synchronous>, transform_indices = @transform_1, window_bounds = array<i64: 8, 128>}, {pipeline_mode = #tpu.pipeline_mode<synchronous>, transform_indices = @transform_2, window_bounds = array<i64: 1, 128>}, {pipeline_mode = #tpu.pipeline_mode<synchronous>, transform_indices = @transform_3, window_bounds = array<i64: 128, 256>}, {pipeline_mode = #tpu.pipeline_mode<synchronous>, transform_indices = @transform_4, window_bounds = array<i64: 1, 256>}, {pipeline_mode = #tpu.pipeline_mode<synchronous>, transform_indices = @transform_5, window_bounds = array<i64: 256, 128>}, {pipeline_mode = #tpu.pipeline_mode<synchronous>, transform_indices = @transform_6, window_bounds = array<i64: 1, 128>}, {pipeline_mode = #tpu.pipeline_mode<synchronous>, transform_indices = @transform_7, window_bounds = array<i64: 128, 8>}, {pipeline_mode = #tpu.pipeline_mode<synchronous>, transform_indices = @transform_8, window_bounds = array<i64: 1, 8>}, {transform_indices = @transform_9, window_bounds = array<i64: 8, 8>}]} {
    %c0 = arith.constant 0 : index
    %c0_0 = arith.constant 0 : index
    %0 = vector.load %arg1[%c0, %c0_0] : memref<8x8xf32, #tpu.memory_space<vmem>>, vector<8x8xf32>
    %c0_1 = arith.constant 0 : index
    %c0_2 = arith.constant 0 : index
    %1 = vector.load %arg2[%c0_1, %c0_2] : memref<8x128xf32, #tpu.memory_space<vmem>>, vector<8x128xf32>
    %cst = arith.constant dense<0.000000e+00> : vector<8x128xf32>
    %2 = tpu.matmul %0, %1, %cst {dimension_numbers = #tpu.dot_dimension_numbers<[1], [0], [0], [1], [0, 0, 1, 1], [], []>} : vector<8x8xf32>, vector<8x128xf32>, vector<8x128xf32> -> vector<8x128xf32>
    %c0_3 = arith.constant 0 : index
    %c0_4 = arith.constant 0 : index
    %3 = vector.load %arg3[%c0_3, %c0_4] : memref<1x128xf32, #tpu.memory_space<vmem>>, vector<1x128xf32>
    %4 = vector.broadcast %3 : vector<1x128xf32> to vector<8x128xf32>
    %5 = arith.addf %2, %4 : vector<8x128xf32>
    %cst_5 = arith.constant 0.000000e+00 : f32
    %6 = vector.broadcast %cst_5 : f32 to vector<8x128xf32>
    %7 = arith.maximumf %5, %6 : vector<8x128xf32>
    %8 = arith.truncf %7 : vector<8x128xf32> to vector<8x128xbf16>
    %c0_6 = arith.constant 0 : index
    %c0_7 = arith.constant 0 : index
    %9 = vector.load %arg4[%c0_6, %c0_7] : memref<128x256xbf16, #tpu.memory_space<vmem>>, vector<128x256xbf16>
    %cst_8 = arith.constant dense<0.000000e+00> : vector<8x256xf32>
    %10 = tpu.matmul %8, %9, %cst_8 {dimension_numbers = #tpu.dot_dimension_numbers<[1], [0], [0], [1], [0, 0, 1, 1], [], []>} : vector<8x128xbf16>, vector<128x256xbf16>, vector<8x256xf32> -> vector<8x256xf32>
    %c0_9 = arith.constant 0 : index
    %c0_10 = arith.constant 0 : index
    %11 = vector.load %arg5[%c0_9, %c0_10] : memref<1x256xf32, #tpu.memory_space<vmem>>, vector<1x256xf32>
    %12 = vector.broadcast %11 : vector<1x256xf32> to vector<8x256xf32>
    %13 = arith.addf %10, %12 : vector<8x256xf32>
    %cst_11 = arith.constant 0.000000e+00 : f32
    %14 = vector.broadcast %cst_11 : f32 to vector<8x256xf32>
    %15 = arith.maximumf %13, %14 : vector<8x256xf32>
    %16 = arith.truncf %15 : vector<8x256xf32> to vector<8x256xbf16>
    %c0_12 = arith.constant 0 : index
    %c0_13 = arith.constant 0 : index
    %17 = vector.load %arg6[%c0_12, %c0_13] : memref<256x128xbf16, #tpu.memory_space<vmem>>, vector<256x128xbf16>
    %cst_14 = arith.constant dense<0.000000e+00> : vector<8x128xf32>
    %18 = tpu.matmul %16, %17, %cst_14 {dimension_numbers = #tpu.dot_dimension_numbers<[1], [0], [0], [1], [0, 0, 1, 1], [], []>} : vector<8x256xbf16>, vector<256x128xbf16>, vector<8x128xf32> -> vector<8x128xf32>
    %c0_15 = arith.constant 0 : index
    %c0_16 = arith.constant 0 : index
    %19 = vector.load %arg7[%c0_15, %c0_16] : memref<1x128xf32, #tpu.memory_space<vmem>>, vector<1x128xf32>
    %20 = vector.broadcast %19 : vector<1x128xf32> to vector<8x128xf32>
    %21 = arith.addf %18, %20 : vector<8x128xf32>
    %cst_17 = arith.constant 0.000000e+00 : f32
    %22 = vector.broadcast %cst_17 : f32 to vector<8x128xf32>
    %23 = arith.maximumf %21, %22 : vector<8x128xf32>
    %24 = arith.truncf %23 : vector<8x128xf32> to vector<8x128xbf16>
    %c0_18 = arith.constant 0 : index
    %c0_19 = arith.constant 0 : index
    %25 = vector.load %arg8[%c0_18, %c0_19] : memref<128x8xbf16, #tpu.memory_space<vmem>>, vector<128x8xbf16>
    %cst_20 = arith.constant dense<0.000000e+00> : vector<8x8xf32>
    %26 = tpu.matmul %24, %25, %cst_20 {dimension_numbers = #tpu.dot_dimension_numbers<[1], [0], [0], [1], [0, 0, 1, 1], [], []>} : vector<8x128xbf16>, vector<128x8xbf16>, vector<8x8xf32> -> vector<8x8xf32>
    %c0_21 = arith.constant 0 : index
    %c0_22 = arith.constant 0 : index
    %27 = vector.load %arg9[%c0_21, %c0_22] : memref<1x8xf32, #tpu.memory_space<vmem>>, vector<1x8xf32>
    %28 = vector.broadcast %27 : vector<1x8xf32> to vector<8x8xf32>
    %29 = arith.addf %26, %28 : vector<8x8xf32>
    %c0_23 = arith.constant 0 : index
    %c0_24 = arith.constant 0 : index
    %30 = vector.load %arg10[%c0_23, %c0_24] : memref<8x8xf32, #tpu.memory_space<vmem>>, vector<8x8xf32>
    tpu.vector_store %arg10[%c0_23, %c0_24], %29 {strides = array<i32>} : memref<8x8xf32, #tpu.memory_space<vmem>>, vector<8x8xf32>,
    return
  }
  func.func @transform_0(%arg0: i32) -> (i32, i32) {
    %c0_i32 = arith.constant 0 : i32
    %c0_i32_0 = arith.constant 0 : i32
    return %arg0, %c0_i32 : i32, i32
  }
  func.func @transform_1(%arg0: i32) -> (i32, i32) {
    %c0_i32 = arith.constant 0 : i32
    %c0_i32_0 = arith.constant 0 : i32
    %c0_i32_1 = arith.constant 0 : i32
    return %c0_i32, %c0_i32_0 : i32, i32
  }
  func.func @transform_2(%arg0: i32) -> (i32, i32) {
    %c0_i32 = arith.constant 0 : i32
    %c0_i32_0 = arith.constant 0 : i32
    %c0_i32_1 = arith.constant 0 : i32
    return %c0_i32, %c0_i32_0 : i32, i32
  }
  func.func @transform_3(%arg0: i32) -> (i32, i32) {
    %c0_i32 = arith.constant 0 : i32
    %c0_i32_0 = arith.constant 0 : i32
    %c0_i32_1 = arith.constant 0 : i32
    return %c0_i32, %c0_i32_0 : i32, i32
  }
  func.func @transform_4(%arg0: i32) -> (i32, i32) {
    %c0_i32 = arith.constant 0 : i32
    %c0_i32_0 = arith.constant 0 : i32
    %c0_i32_1 = arith.constant 0 : i32
    return %c0_i32, %c0_i32_0 : i32, i32
  }
  func.func @transform_5(%arg0: i32) -> (i32, i32) {
    %c0_i32 = arith.constant 0 : i32
    %c0_i32_0 = arith.constant 0 : i32
    %c0_i32_1 = arith.constant 0 : i32
    return %c0_i32, %c0_i32_0 : i32, i32
  }
  func.func @transform_6(%arg0: i32) -> (i32, i32) {
    %c0_i32 = arith.constant 0 : i32
    %c0_i32_0 = arith.constant 0 : i32
    %c0_i32_1 = arith.constant 0 : i32
    return %c0_i32, %c0_i32_0 : i32, i32
  }
  func.func @transform_7(%arg0: i32) -> (i32, i32) {
    %c0_i32 = arith.constant 0 : i32
    %c0_i32_0 = arith.constant 0 : i32
    %c0_i32_1 = arith.constant 0 : i32
    return %c0_i32, %c0_i32_0 : i32, i32
  }
  func.func @transform_8(%arg0: i32) -> (i32, i32) {
    %c0_i32 = arith.constant 0 : i32
    %c0_i32_0 = arith.constant 0 : i32
    %c0_i32_1 = arith.constant 0 : i32
    return %c0_i32, %c0_i32_0 : i32, i32
  }
  func.func @transform_9(%arg0: i32) -> (i32, i32) {
    %c0_i32 = arith.constant 0 : i32
    %c0_i32_0 = arith.constant 0 : i32
    return %arg0, %c0_i32 : i32, i32
  }
}

</mosaic_0001>

<bundles_post_ra>
// kernel: _dqn_forward_impl.1
= control target key start
LH: loop header
LB: loop body
LE: loop exit
PB: predicated region body
PF: predicated region fallthrough
CT: control target
= control target key end

     0   :  { %14 = vsyncpa [#allocation3], 0  ;;  %s847_s0 = inlined_call_operand.vmem [shape: f32[8,8], index: 0, kind: input, shape index: {}]   ;;  %s848_s1 = inlined_call_operand.vmem [shape: f32[8,128], index: 1, kind: input, shape index: {}]   ;;  %s849_s2 = inlined_call_operand.vmem [shape: f32[1,128], index: 2, kind: input, shape index: {}]   ;;  %s850_s3 = inlined_call_operand.hbm [shape: bf16[128,256], index: 3, kind: input, shape index: {}]   ;;  %s851_s4 = inlined_call_operand.vmem [shape: f32[1,256], index: 4, kind: input, shape index: {}]   ;;  %s852_s5 = inlined_call_operand.hbm [shape: bf16[256,128], index: 5, kind: input, shape index: {}]   ;;  %s853_s6 = inlined_call_operand.vmem [shape: f32[1,128], index: 6, kind: input, shape index: {}]   ;;  %s854_s7 = inlined_call_operand.vmem [shape: bf16[128,8], index: 7, kind: input, shape index: {}]   ;;  %s855_s8 = inlined_call_operand.vmem [shape: f32[1,8], index: 8, kind: input, shape index: {}]   ;;  %s856_s9 = inlined_call_operand.vmem [shape: f32[8,8], index: 9, kind: output, shape index: {}]  }
   0x1   :  { %s26_s11 = sshll.u32 %s850_s3, 4  ;;  %s27_s11 = int_to_ptr.hbm [resolvable:$true] %s26_s11 }
   0x2   :  { %15 = vsyncpa [#allocation5], 0  ;;  %s738_s12 = smov [#allocation2]   ;;  %s41_s16 = sshll.u32 %s852_s5, 4  ;;  %s42_s16 = int_to_ptr.hbm [resolvable:$true] %s41_s16 }
   0x3   :  { %s28_s13 = sshll.u32 %s738_s12, 4  ;;  %s739_s17 = smov 128   ;;  %s29_s13 = int_to_ptr.vmem [resolvable:$true] %s28_s13 }
   0x4   :  { %s740_s18 = smov 8   ;;  %s741_s19 = smov [#allocation4]  }
   0x5   :  { %34 = dma.hbm_to_vmem [thread:$0]  %s27_s11, 2048, %s29_s13, [#allocation3], %s739_s17, %s739_s17, %s740_s18  }
   0x6   :  { %s43_s20 = sshll.u32 %s741_s19, 4  ;;  %s742_s21 = smov 64   ;;  %s44_s20 = int_to_ptr.vmem [resolvable:$true] %s43_s20 }
   0x7   :  { %s743_s22 = smov 4  }
   0x8   :  { %49 = dma.hbm_to_vmem [thread:$0]  %s42_s16, 2048, %s44_s20, [#allocation5], %s742_s21, %s742_s21, %s743_s22  }
   0x9   :  { %734 = dma.done.wait [#allocation3], 2048  }
   0xa   :  { %735 = vsyncadd [#allocation3], 4294965248 }
   0xb   :  { %736 = dma.done.wait [#allocation5], 2048  }
   0xc   :  { %737 = vsyncadd [#allocation5], 4294965248  ;;  %vm70_vm0 = vcmask 64512   ;;  %v65_v0 = vld [vmem:[%s848_s1] sm:$0xff]  ;;  %v535_v2 = vld [vmem:[#allocation2 + $0x70] sm:$0xf] }
   0xd   :  { %v64_v1 = vld [vmem:[%s847_s0] sm:$0xff]  ;;  %89 = vmatpush.msra.mxu0 %v65_v0  ;;  %v652_v3 = vld [vmem:[#allocation2 + $0x74] sm:$0xf0]  ;;  %v651_v4 = vld [vmem:[#allocation2 + $0x74] sm:$0xf] }
   0xe   :  { %v537_v5 = vld [vmem:[#allocation2 + $0x78] sm:$0xf0]  ;;  %476 = vmatmul.msk.f32.vlgmr.msra.gmra.mxu0 %vm70_vm0, %v64_v1  ;;  %v536_v6 = vor.u32 %v652_v3, %v535_v2  ;;  %v527_v8 = vld [vmem:[#allocation2 + $0x60] sm:$0xf]  ;;  %v650_v9 = vld [vmem:[#allocation2 + $0x64] sm:$0xf0] }
   0xf   :  { %v540_v7 = vor.u32 %v651_v4, %v537_v5  ;;  %v649_v10 = vld [vmem:[#allocation2 + $0x64] sm:$0xf]  ;;  %v529_v11 = vld [vmem:[#allocation2 + $0x68] sm:$0xf0]  ;;  %v528_v12 = vor.u32 %v650_v9, %v527_v8  ;;  %v519_v14 = vld [vmem:[#allocation2 + $0x50] sm:$0xf] }
  0x10   :  { %198 = vmatpush.bf16.msra.mxu1 %v536_v6  ;;  %v532_v13 = vor.u32 %v649_v10, %v529_v11  ;;  %v648_v15 = vld [vmem:[#allocation2 + $0x54] sm:$0xf0]  ;;  %v647_v16 = vld [vmem:[#allocation2 + $0x54] sm:$0xf]  ;;  %v521_v17 = vld [vmem:[#allocation2 + $0x58] sm:$0xf0] }
  0x11   :  { %211 = vmatpush.bf16.msra.mxu2 %v540_v7  ;;  %v511_v18 = vld [vmem:[#allocation2 + $0x40] sm:$0xf]  ;;  %v520_v19 = vor.u32 %v648_v15, %v519_v14  ;;  %v524_v20 = vor.u32 %v647_v16, %v521_v17  ;;  %v646_v21 = vld [vmem:[#allocation2 + $0x44] sm:$0xf0]  ;;  %v645_v22 = vld [vmem:[#allocation2 + $0x44] sm:$0xf] }
  0x12   :  { %v513_v23 = vld [vmem:[#allocation2 + $0x48] sm:$0xf0]  ;;  %v512_v24 = vor.u32 %v646_v21, %v511_v18  ;;  %v503_v26 = vld [vmem:[#allocation2 + $0x30] sm:$0xf]  ;;  %v644_v27 = vld [vmem:[#allocation2 + $0x34] sm:$0xf0] }
  0x13   :  { %v516_v25 = vor.u32 %v645_v22, %v513_v23  ;;  %v643_v28 = vld [vmem:[#allocation2 + $0x34] sm:$0xf]  ;;  %v505_v29 = vld [vmem:[#allocation2 + $0x38] sm:$0xf0]  ;;  %v504_v30 = vor.u32 %v644_v27, %v503_v26  ;;  %v495_v32 = vld [vmem:[#allocation2 + $0x20] sm:$0xf] }
  0x14   :  { %199 = vmatpush.bf16.msra.mxu1 %v528_v12  ;;  %v508_v31 = vor.u32 %v643_v28, %v505_v29  ;;  %v642_v33 = vld [vmem:[#allocation2 + $0x24] sm:$0xf0]  ;;  %v641_v34 = vld [vmem:[#allocation2 + $0x24] sm:$0xf]  ;;  %v497_v35 = vld [vmem:[#allocation2 + $0x28] sm:$0xf0] }
  0x15   :  { %212 = vmatpush.bf16.msra.mxu2 %v532_v13  ;;  %v496_v36 = vor.u32 %v642_v33, %v495_v32  ;;  %v500_v37 = vor.u32 %v641_v34, %v497_v35  ;;  %v487_v38 = vld [vmem:[#allocation2 + $0x10] sm:$0xf]  ;;  %v640_v39 = vld [vmem:[#allocation2 + $0x14] sm:$0xf0]  ;;  %v639_v40 = vld [vmem:[#allocation2 + $0x14] sm:$0xf] }
  0x16   :  { %v488_v41 = vor.u32 %v640_v39, %v487_v38  ;;  %v489_v42 = vld [vmem:[#allocation2 + $0x18] sm:$0xf0]  ;;  %v479_v44 = vld [vmem:[#allocation2] sm:$0xf]  ;;  %v638_v45 = vld [vmem:[#allocation2 + $0x4] sm:$0xf0] }
  0x17   :  { %v492_v43 = vor.u32 %v639_v40, %v489_v42  ;;  %v637_v46 = vld [vmem:[#allocation2 + $0x4] sm:$0xf]  ;;  %v480_v47 = vor.u32 %v638_v45, %v479_v44  ;;  %v481_v48 = vld [vmem:[#allocation2 + $0x8] sm:$0xf0]  ;;  %v660_v50 = vld [vmem:[#allocation4 + $0x38] sm:$0xff] }
  0x18   :  { %200 = vmatpush.bf16.msra.mxu1 %v520_v19  ;;  %v484_v49 = vor.u32 %v637_v46, %v481_v48  ;;  %v668_v51 = vld [vmem:[#allocation4 + $0x78] sm:$0xff]  ;;  %360 = vmatpush.bf16.msra.mxu3 %v660_v50  ;;  %v659_v52 = vld [vmem:[#allocation4 + $0x30] sm:$0xff]  ;;  %v658_v54 = vld [vmem:[#allocation4 + $0x28] sm:$0xff] }
  0x19   :  { %213 = vmatpush.bf16.msra.mxu2 %v524_v20  ;;  %373 = vmatpush.bf16.msrb.mxu0 %v668_v51  ;;  %v667_v53 = vld [vmem:[#allocation4 + $0x70] sm:$0xff]  ;;  %v666_v55 = vld [vmem:[#allocation4 + $0x68] sm:$0xff]  ;;  %v657_v56 = vld [vmem:[#allocation4 + $0x20] sm:$0xff] }
  0x1a   :  { %v665_v57 = vld [vmem:[#allocation4 + $0x60] sm:$0xff]  ;;  %v656_v58 = vld [vmem:[#allocation4 + $0x18] sm:$0xff]  ;;  %v655_v60 = vld [vmem:[#allocation4 + $0x10] sm:$0xff] }
  0x1b   :  { %v664_v59 = vld [vmem:[#allocation4 + $0x58] sm:$0xff]  ;;  %v683_v61 = vld [vmem:[%s849_s2] ss:$0 sm:$0xff]  ;;  %v654_v2 = vld [vmem:[#allocation4 + $0x8] sm:$0xff] }
  0x1c   :  { %201 = vmatpush.bf16.msra.mxu1 %v512_v24  ;;  %361 = vmatpush.bf16.msra.mxu3 %v659_v52  ;;  %v663_v3 = vld [vmem:[#allocation4 + $0x50] sm:$0xff]  ;;  %v653_v4 = vld [vmem:[#allocation4] sm:$0xff]  ;;  %v662_v5 = vld [vmem:[#allocation4 + $0x48] sm:$0xff] }
  0x1d   :  { %214 = vmatpush.bf16.msra.mxu2 %v516_v25  ;;  %374 = vmatpush.bf16.msrb.mxu0 %v667_v53  ;;  %v661_v6 = vld [vmem:[#allocation4 + $0x40] sm:$0xff]  ;;  %v676_v7 = vld [vmem:[%s854_s7 + $0x38] sm:$0xff]  ;;  %v675_v8 = vld [vmem:[%s854_s7 + $0x30] sm:$0xff] }
  0x1e   :  { %v674_v9 = vld [vmem:[%s854_s7 + $0x28] sm:$0xff]  ;;  %v673_v10 = vld [vmem:[%s854_s7 + $0x20] sm:$0xff]  ;;  %v672_v12 = vld [vmem:[%s854_s7 + $0x18] sm:$0xff] }
  0x1f   :  { %v112_v11 = vld [vmem:[%s851_s4] sm:$0x3]  ;;  %v671_v15 = vld [vmem:[%s854_s7 + $0x10] sm:$0xff]  ;;  %v670_v26 = vld [vmem:[%s854_s7 + $0x8] sm:$0xff] }
  0x20   :  { %202 = vmatpush.bf16.msra.mxu1 %v504_v30  ;;  %362 = vmatpush.bf16.msra.mxu3 %v658_v54  ;;  %v114_v13 = vperm.slane %v112_v11, 0  ;;  %v115_v18 = vperm.slane %v112_v11, 1  ;;  %v669_v27 = vld [vmem:[%s854_s7] sm:$0xff] }
  0x21   :  { %215 = vmatpush.bf16.msra.mxu2 %v508_v31  ;;  %375 = vmatpush.bf16.msrb.mxu0 %v666_v55  ;;  %v684_v28 = vld [vmem:[%s853_s6] ss:$0 sm:$0xff] }
  0x24   :  { %203 = vmatpush.bf16.msra.mxu1 %v496_v36  ;;  %363 = vmatpush.bf16.msra.mxu3 %v657_v56 }
  0x25   :  { %216 = vmatpush.bf16.msra.mxu2 %v500_v37  ;;  %376 = vmatpush.bf16.msrb.mxu0 %v665_v57  ;;  %v685_v37 = vld [vmem:[%s855_s8] ss:$0 sm:$0xff] }
  0x28   :  { %204 = vmatpush.bf16.msra.mxu1 %v488_v41  ;;  %364 = vmatpush.bf16.msra.mxu3 %v656_v58 }
  0x29   :  { %217 = vmatpush.bf16.msra.mxu2 %v492_v43  ;;  %377 = vmatpush.bf16.msrb.mxu0 %v664_v59 }
  0x2c   :  { %205 = vmatpush.bf16.msra.mxu1 %v480_v47  ;;  %365 = vmatpush.bf16.msra.mxu3 %v655_v60 }
  0x2d   :  { %218 = vmatpush.bf16.msra.mxu2 %v484_v49  ;;  %378 = vmatpush.bf16.msrb.mxu0 %v663_v3 }
  0x30   :  { %366 = vmatpush.bf16.msra.mxu3 %v654_v2  ;;  %456 = vmatpush.bf16.msrb.mxu1 %v676_v7 }
  0x31   :  { %379 = vmatpush.bf16.msrb.mxu0 %v662_v5 }
  0x34   :  { %367 = vmatpush.bf16.msra.mxu3 %v653_v4  ;;  %457 = vmatpush.bf16.msrb.mxu1 %v675_v8 }
  0x35   :  { %380 = vmatpush.bf16.msrb.mxu0 %v661_v6 }
  0x38   :  { %458 = vmatpush.bf16.msrb.mxu1 %v674_v9 }
  0x3c   :  { %459 = vmatpush.bf16.msrb.mxu1 %v673_v10 }
  0x40   :  { %460 = vmatpush.bf16.msrb.mxu1 %v672_v12 }
  0x44   :  { %461 = vmatpush.bf16.msrb.mxu1 %v671_v15 }
  0x48   :  { %462 = vmatpush.bf16.msrb.mxu1 %v670_v26 }
  0x4c   :  { %463 = vmatpush.bf16.msrb.mxu1 %v669_v27 }
  0x8b   :  { %v91_v62 = vpop.f32.mrf.mxu0 }
  0x8c   :  { %v92_v63 = vadd.f32 %v683_v61, %v91_v62 }
  0x8e   :  { %v94_v0 = vmax.f32 %v92_v63, 0.0 }
  0x90   :  { %v95_v1 = vpack.c.bf16 %v94_v0, %v94_v0 }
  0x92   :  { %206 = vmatmul.bf16.vlgmr.msra.gmra.mxu1 %v95_v1  ;;  %219 = vmatmul.bf16.vlgmr.msra.gmra.mxu2 %v95_v1 }
 0x10f   :  { %v207_v14 = vpop.f32.mrf.mxu1 }
 0x110   :  { %v208_v16 = vadd.f32 %v207_v14, %v114_v13 }
 0x112   :  { %v224_v17 = vmax.f32 %v208_v16, 0.0 }
 0x114   :  { %v226_v19 = vpack.c.bf16 %v224_v17, %v224_v17 }
 0x115   :  { %v220_v20 = vpop.f32.mrf.mxu2 }
 0x116   :  { %v221_v21 = vadd.f32 %v220_v20, %v115_v18  ;;  %368 = vmatmul.bf16.vlgmr.msra.gmra.mxu3 %v226_v19 }
 0x117   :  { %v209_v22 = vpop.f32.mrf.mxu1 }
 0x118   :  { %v225_v23 = vmax.f32 %v221_v21, 0.0 }
 0x11a   :  { %v227_v24 = vpack.c.bf16 %v225_v23, %v225_v23 }
 0x11c   :  { %381 = vmatmul.bf16.vlgmr.msrb.gmra.mxu0 %v227_v24 }
 0x11d   :  { %v222_v25 = vpop.f32.mrf.mxu2 }
 0x199   :  { %v369_v29 = vpop.f32.mrf.mxu3  ;;  %v382_v30 = vpop.f32.mrf.mxu0 }
 0x19a   :  { %v370_v31 = vadd.f32 %v684_v28, %v369_v29 }
 0x19c   :  { %v383_v32 = vadd.f32 %v382_v30, %v370_v31 }
 0x19e   :  { %v386_v33 = vmax.f32 %v383_v32, 0.0 }
 0x1a0   :  { %v387_v34 = vpack.c.bf16 %v386_v33, %v386_v33 }
 0x1a1   :  { %v371_v35 = vpop.f32.mrf.mxu3  ;;  %v384_v36 = vpop.f32.mrf.mxu0 }
 0x1a2   :  { %464 = vmatmul.bf16.vlgmr.msrb.gmra.mxu1 %v387_v34 }
 0x21f   :  { %v465_v38 = vpop.f32.mrf.mxu1 }
 0x220   :  { %v466_v39 = vadd.f32 %v685_v37, %v465_v38 }
 0x222   :  { %469 = vst.msk [vmem:[%s856_s9] sm:$0xff] %vm70_vm0, %v466_v39 }
 0x227   :  { %v467_v40 = vpop.f32.mrf.mxu1 }
 0x228   :  { %474 = vsyncpa [#allocation3], 1 }
 0x229   :  { %475 = vsyncpa [#allocation5], 1 }

</bundles_post_ra>
